<compile_context>
chip_gen: v5e
topology: v5e:2x2
jax: 0.10.0
libtpu: 0.0.40
codegen_flags: <defaults>
</compile_context>

<pallas_src>
import functools

import numpy as np

import jax
import jax.numpy as jnp
from jax.experimental import pallas as pl
from jax.experimental.pallas import tpu as pltpu


def _focal_loss_kernel(x_ref, t_ref, out_ref, *, gamma, alpha, num_classes,
                       tile_rows, total_l, needs_mask):
    """One grid step.

    x_ref:   (1, C, TILE_R, 128)  logits (native dtype, upcast here)
    t_ref:   (1, 1, TILE_R, 128)  integer class indices
    out_ref: (1, 1, 128)          f32 lane-wise partial sums for this tile
    """
    t = t_ref[0, 0].astype(jnp.int32)                       # (TILE_R, 128)

    # Running max over classes: short unrolled loop over dense slabs.
    m = x_ref[0, 0].astype(jnp.float32)
    for ci in range(1, num_classes):
        m = jnp.maximum(m, x_ref[0, ci].astype(jnp.float32))

    # Second pass: softmax denominator + gather of x[target] / alpha[target]
    # via per-class selects (no lane/sublane gather needed).
    s = None
    x_t = None
    a_t = None
    for ci in range(num_classes):
        xi = x_ref[0, ci].astype(jnp.float32)
        e = jnp.exp(xi - m)
        s = e if s is None else s + e
        sel = t == ci
        x_t = jnp.where(sel, xi, 0.0 if x_t is None else x_t)
        if alpha is not None:
            a_t = jnp.where(sel, alpha[ci], 0.0 if a_t is None else a_t)

    logpt = (x_t - m) - jnp.log(s)                          # log_softmax[target]
    pt = jnp.exp(logpt)                                     # before alpha (torch)
    if alpha is not None:
        logpt = logpt * a_t

    one_minus_pt = 1.0 - pt
    g = float(gamma)
    if g == 0.0:
        loss = -logpt
    elif g > 0.0 and g == int(g):
        focal = one_minus_pt                                # explicit multiplies
        for _ in range(int(g) - 1):
            focal = focal * one_minus_pt
        loss = -focal * logpt
    else:
        loss = -(one_minus_pt ** g) * logpt                 # non-integer gamma

    if needs_mask:
        # Ragged / padded tail: *select* (NaN-safe), never multiply.
        row = jax.lax.broadcasted_iota(jnp.int32, loss.shape, 0)
        lane = jax.lax.broadcasted_iota(jnp.int32, loss.shape, 1)
        pos = (pl.program_id(1) * tile_rows + row) * 128 + lane
        loss = jnp.where(pos < total_l, loss, 0.0)

    # In-kernel partial reduction (sublane reduce -> XLU), lane-dense store.
    out_ref[0] = jnp.sum(loss, axis=0, keepdims=True)       # (1, 128)


def _pick_tile_rows(rows, c, n, x_itemsize, t_itemsize,
                    vmem_budget_bytes=10 * 1024 * 1024, live_f32_slabs=10):
    """Rows-of-128 per tile, from a VMEM budget incl. f32 intermediates."""
    per_row = 128 * (2 * c * x_itemsize        # logits block, double-buffered
                     + 2 * t_itemsize          # target block, double-buffered
                     + live_f32_slabs * 4)     # live f32 temporaries in-kernel
    max_rows = max(8, (int(vmem_budget_bytes) // per_row) // 8 * 8)
    tile_r = rows if rows <= max_rows else max_rows
    # Keep >= ~8 grid steps so both v7x TensorCores get work and the DMA
    # pipeline has something to overlap, even for tiny batch counts.
    min_steps = 8
    while tile_r > 8 and n * pl.cdiv(rows, tile_r) < min_steps:
        tile_r = max(8, ((tile_r // 2) + 7) // 8 * 8)
    return tile_r


def focal_loss(logits_nchw, target_nhw, *, gamma=0.0, alpha=None,
               size_average=False):
    """Pallas TPU forward matching the PyTorch FocalLoss module (NCHW input)."""
    n, c, h, w = logits_nchw.shape
    l = h * w
    rows = pl.cdiv(l, 128)
    l_pad = rows * 128

    # Static alpha vector (a constructor argument in the PyTorch module).
    if alpha is None:
        alpha_t = None
    elif isinstance(alpha, (float, int)):
        # PyTorch builds [alpha, 1 - alpha]; only valid when C == 2.
        assert c == 2, "scalar alpha builds [alpha, 1-alpha]; requires C == 2"
        alpha_t = (float(alpha), 1.0 - float(alpha))
    else:
        alpha_t = tuple(float(a) for a in np.asarray(alpha).reshape(-1))
        assert len(alpha_t) == c, "per-class alpha must have length C"

    # Native layout; reshapes below are free (contiguous).
    x = logits_nchw.reshape(n, c, l)
    t = target_nhw.reshape(n, 1, l)
    if t.dtype not in (jnp.dtype('int8'), jnp.dtype('int16'), jnp.dtype('int32')):
        t = t.astype(jnp.int32)   # widen only if producer supplied a wide/odd dtype
    if l_pad != l:
        pad = ((0, 0), (0, 0), (0, l_pad - l))
        x = jnp.pad(x, pad)
        t = jnp.pad(t, pad)
    x = x.reshape(n, c, rows, 128)
    t = t.reshape(n, 1, rows, 128)

    tile_r = _pick_tile_rows(rows, c, n, jnp.dtype(x.dtype).itemsize,
                             jnp.dtype(t.dtype).itemsize)
    grid_r = pl.cdiv(rows, tile_r)
    grid = (n, grid_r)
    needs_mask = (grid_r * tile_r * 128) != l

    kernel = functools.partial(
        _focal_loss_kernel, gamma=float(gamma), alpha=alpha_t, num_classes=c,
        tile_rows=tile_r, total_l=l, needs_mask=needs_mask)

    partials = pl.pallas_call(
        kernel,
        out_shape=jax.ShapeDtypeStruct((n, 1, grid_r * 128), jnp.float32),
        grid_spec=pltpu.PrefetchScalarGridSpec(
            num_scalar_prefetch=0,
            grid=grid,
            in_specs=[
                pl.BlockSpec((1, c, tile_r, 128), lambda i, r: (i, 0, r, 0)),
                pl.BlockSpec((1, 1, tile_r, 128), lambda i, r: (i, 0, r, 0)),
            ],
            out_specs=pl.BlockSpec((1, 1, 128), lambda i, r: (i, 0, r)),
        ),
        compiler_params=pltpu.CompilerParams(
            dimension_semantics=("parallel", "parallel")),
    )(x, t)

    # Tiny final reduction in plain JAX (keeps the grid fully parallel).
    total = jnp.sum(partials)
    if size_average:
        return total / (n * l)
    return total


def _reference_focal_loss(logits_nchw, target_nhw, gamma, alpha_vec,
                          size_average):
    n, c, h, w = logits_nchw.shape
    x = logits_nchw.reshape(n, c, h * w).transpose(0, 2, 1).reshape(-1, c)
    t = target_nhw.reshape(-1)
    logp = jax.nn.log_softmax(x.astype(jnp.float32), axis=1)
    logpt = jnp.take_along_axis(logp, t[:, None], axis=1)[:, 0]
    pt = jnp.exp(logpt)
    if alpha_vec is not None:
        logpt = logpt * alpha_vec[t]
    loss = -1.0 * (1.0 - pt) ** gamma * logpt
    return loss.mean() if size_average else loss.sum()


if __name__ == "__main__":
    key = jax.random.PRNGKey(0)
    k1, k2 = jax.random.split(key)

    N, C, H, W = 2, 4, 16, 16                 # 512 positions total
    logits = jax.random.normal(k1, (N, C, H, W), dtype=jnp.float32)
    target = jax.random.randint(k2, (N, H, W), 0, C, dtype=jnp.int32)

    gamma = 2.0
    alpha = [0.25, 0.25, 0.25, 0.25]          # per-class alpha, length C

    # Sum reduction with per-class alpha.
    result = focal_loss(logits, target, gamma=gamma, alpha=alpha,
                        size_average=False)
    result = jax.block_until_ready(result)
    ref = _reference_focal_loss(logits, target, gamma,
                                jnp.asarray(alpha, jnp.float32),
                                size_average=False)
    assert jnp.allclose(result, ref, rtol=1e-4, atol=1e-4), (result, ref)

    # Mean reduction, no alpha (alpha branch elided from the kernel).
    result_mean = focal_loss(logits, target, gamma=gamma, alpha=None,
                             size_average=True)
    result_mean = jax.block_until_ready(result_mean)
    ref_mean = _reference_focal_loss(logits, target, gamma, None,
                                     size_average=True)
    assert jnp.allclose(result_mean, ref_mean, rtol=1e-4, atol=1e-5), (
        result_mean, ref_mean)

    print("KERNEL_OK")
</pallas_src>

<mosaic_0001>
module attributes {stable_mosaic.version = 11 : i64} {
  func.func @_focal_loss_kernel(%arg0: i32, %arg1: i32, %arg2: memref<1x4x2x128xf32, #tpu.memory_space<vmem>>, %arg3: memref<1x1x2x128xi32, #tpu.memory_space<vmem>>, %arg4: memref<1x1x128xf32, #tpu.memory_space<vmem>>) attributes {dimension_semantics = [#tpu.dimension_semantics<parallel>, #tpu.dimension_semantics<parallel>], iteration_bounds = array<i64: 2, 1>, scalar_prefetch = 0 : i64, scratch_operands = 0 : i64, tpu.core_type = #tpu.core_type<tc>, window_params = [{transform_indices = @transform_0, window_bounds = array<i64: 1, 4, 2, 128>}, {transform_indices = @transform_1, window_bounds = array<i64: 1, 1, 2, 128>}, {transform_indices = @transform_2, window_bounds = array<i64: 1, 1, 128>}]} {
    %c0 = arith.constant 0 : index
    %c0_0 = arith.constant 0 : index
    %c0_1 = arith.constant 0 : index
    %c0_2 = arith.constant 0 : index
    %0 = vector.load %arg3[%c0, %c0_0, %c0_1, %c0_2] : memref<1x1x2x128xi32, #tpu.memory_space<vmem>>, vector<1x1x2x128xi32>
    %1 = vector.shape_cast %0 : vector<1x1x2x128xi32> to vector<2x128xi32>
    %c0_3 = arith.constant 0 : index
    %c0_4 = arith.constant 0 : index
    %c0_5 = arith.constant 0 : index
    %c0_6 = arith.constant 0 : index
    %2 = vector.load %arg2[%c0_3, %c0_4, %c0_5, %c0_6] : memref<1x4x2x128xf32, #tpu.memory_space<vmem>>, vector<1x1x2x128xf32>
    %3 = vector.shape_cast %2 : vector<1x1x2x128xf32> to vector<2x128xf32>
    %c0_7 = arith.constant 0 : index
    %c1 = arith.constant 1 : index
    %c0_8 = arith.constant 0 : index
    %c0_9 = arith.constant 0 : index
    %4 = vector.load %arg2[%c0_7, %c1, %c0_8, %c0_9] : memref<1x4x2x128xf32, #tpu.memory_space<vmem>>, vector<1x1x2x128xf32>
    %5 = vector.shape_cast %4 : vector<1x1x2x128xf32> to vector<2x128xf32>
    %6 = arith.maximumf %3, %5 : vector<2x128xf32>
    %c0_10 = arith.constant 0 : index
    %c2 = arith.constant 2 : index
    %c0_11 = arith.constant 0 : index
    %c0_12 = arith.constant 0 : index
    %7 = vector.load %arg2[%c0_10, %c2, %c0_11, %c0_12] : memref<1x4x2x128xf32, #tpu.memory_space<vmem>>, vector<1x1x2x128xf32>
    %8 = vector.shape_cast %7 : vector<1x1x2x128xf32> to vector<2x128xf32>
    %9 = arith.maximumf %6, %8 : vector<2x128xf32>
    %c0_13 = arith.constant 0 : index
    %c3 = arith.constant 3 : index
    %c0_14 = arith.constant 0 : index
    %c0_15 = arith.constant 0 : index
    %10 = vector.load %arg2[%c0_13, %c3, %c0_14, %c0_15] : memref<1x4x2x128xf32, #tpu.memory_space<vmem>>, vector<1x1x2x128xf32>
    %11 = vector.shape_cast %10 : vector<1x1x2x128xf32> to vector<2x128xf32>
    %12 = arith.maximumf %9, %11 : vector<2x128xf32>
    %c0_16 = arith.constant 0 : index
    %c0_17 = arith.constant 0 : index
    %c0_18 = arith.constant 0 : index
    %c0_19 = arith.constant 0 : index
    %13 = vector.load %arg2[%c0_16, %c0_17, %c0_18, %c0_19] : memref<1x4x2x128xf32, #tpu.memory_space<vmem>>, vector<1x1x2x128xf32>
    %14 = vector.shape_cast %13 : vector<1x1x2x128xf32> to vector<2x128xf32>
    %15 = arith.subf %14, %12 : vector<2x128xf32>
    %16 = math.exp %15 : vector<2x128xf32>
    %c0_i32 = arith.constant 0 : i32
    %17 = vector.broadcast %c0_i32 : i32 to vector<2x128xi32>
    %18 = arith.cmpi eq, %1, %17 : vector<2x128xi32>
    %cst = arith.constant 0.000000e+00 : f32
    %19 = vector.broadcast %cst : f32 to vector<2x128xf32>
    %20 = arith.select %18, %14, %19 : vector<2x128xi1>, vector<2x128xf32>
    %cst_20 = arith.constant 2.500000e-01 : f32
    %cst_21 = arith.constant 0.000000e+00 : f32
    %21 = vector.broadcast %cst_20 : f32 to vector<2x128xf32>
    %22 = vector.broadcast %cst_21 : f32 to vector<2x128xf32>
    %23 = arith.select %18, %21, %22 : vector<2x128xi1>, vector<2x128xf32>
    %c0_22 = arith.constant 0 : index
    %c1_23 = arith.constant 1 : index
    %c0_24 = arith.constant 0 : index
    %c0_25 = arith.constant 0 : index
    %24 = vector.load %arg2[%c0_22, %c1_23, %c0_24, %c0_25] : memref<1x4x2x128xf32, #tpu.memory_space<vmem>>, vector<1x1x2x128xf32>
    %25 = vector.shape_cast %24 : vector<1x1x2x128xf32> to vector<2x128xf32>
    %26 = arith.subf %25, %12 : vector<2x128xf32>
    %27 = math.exp %26 : vector<2x128xf32>
    %28 = arith.addf %16, %27 : vector<2x128xf32>
    %c1_i32 = arith.constant 1 : i32
    %29 = vector.broadcast %c1_i32 : i32 to vector<2x128xi32>
    %30 = arith.cmpi eq, %1, %29 : vector<2x128xi32>
    %31 = arith.select %30, %25, %20 : vector<2x128xi1>, vector<2x128xf32>
    %cst_26 = arith.constant 2.500000e-01 : f32
    %32 = vector.broadcast %cst_26 : f32 to vector<2x128xf32>
    %33 = arith.select %30, %32, %23 : vector<2x128xi1>, vector<2x128xf32>
    %c0_27 = arith.constant 0 : index
    %c2_28 = arith.constant 2 : index
    %c0_29 = arith.constant 0 : index
    %c0_30 = arith.constant 0 : index
    %34 = vector.load %arg2[%c0_27, %c2_28, %c0_29, %c0_30] : memref<1x4x2x128xf32, #tpu.memory_space<vmem>>, vector<1x1x2x128xf32>
    %35 = vector.shape_cast %34 : vector<1x1x2x128xf32> to vector<2x128xf32>
    %36 = arith.subf %35, %12 : vector<2x128xf32>
    %37 = math.exp %36 : vector<2x128xf32>
    %38 = arith.addf %28, %37 : vector<2x128xf32>
    %c2_i32 = arith.constant 2 : i32
    %39 = vector.broadcast %c2_i32 : i32 to vector<2x128xi32>
    %40 = arith.cmpi eq, %1, %39 : vector<2x128xi32>
    %41 = arith.select %40, %35, %31 : vector<2x128xi1>, vector<2x128xf32>
    %cst_31 = arith.constant 2.500000e-01 : f32
    %42 = vector.broadcast %cst_31 : f32 to vector<2x128xf32>
    %43 = arith.select %40, %42, %33 : vector<2x128xi1>, vector<2x128xf32>
    %c0_32 = arith.constant 0 : index
    %c3_33 = arith.constant 3 : index
    %c0_34 = arith.constant 0 : index
    %c0_35 = arith.constant 0 : index
    %44 = vector.load %arg2[%c0_32, %c3_33, %c0_34, %c0_35] : memref<1x4x2x128xf32, #tpu.memory_space<vmem>>, vector<1x1x2x128xf32>
    %45 = vector.shape_cast %44 : vector<1x1x2x128xf32> to vector<2x128xf32>
    %46 = arith.subf %45, %12 : vector<2x128xf32>
    %47 = math.exp %46 : vector<2x128xf32>
    %48 = arith.addf %38, %47 : vector<2x128xf32>
    %c3_i32 = arith.constant 3 : i32
    %49 = vector.broadcast %c3_i32 : i32 to vector<2x128xi32>
    %50 = arith.cmpi eq, %1, %49 : vector<2x128xi32>
    %51 = arith.select %50, %45, %41 : vector<2x128xi1>, vector<2x128xf32>
    %cst_36 = arith.constant 2.500000e-01 : f32
    %52 = vector.broadcast %cst_36 : f32 to vector<2x128xf32>
    %53 = arith.select %50, %52, %43 : vector<2x128xi1>, vector<2x128xf32>
    %54 = arith.subf %51, %12 : vector<2x128xf32>
    %55 = math.log %48 : vector<2x128xf32>
    %56 = arith.subf %54, %55 : vector<2x128xf32>
    %57 = math.exp %56 : vector<2x128xf32>
    %58 = arith.mulf %56, %53 : vector<2x128xf32>
    %cst_37 = arith.constant 1.000000e+00 : f32
    %59 = vector.broadcast %cst_37 : f32 to vector<2x128xf32>
    %60 = arith.subf %59, %57 : vector<2x128xf32>
    %61 = arith.mulf %60, %60 : vector<2x128xf32>
    %cst_38 = arith.constant 0.000000e+00 : f32
    %62 = vector.broadcast %cst_38 : f32 to vector<2x128xf32>
    %63 = arith.subf %62, %61 : vector<2x128xf32>
    %64 = arith.mulf %63, %58 : vector<2x128xf32>
    %cst_39 = arith.constant dense<0.000000e+00> : vector<128xf32>
    %65 = vector.multi_reduction <add>, %64, %cst_39 [0] : vector<2x128xf32> to vector<128xf32>
    %66 = vector.shape_cast %65 : vector<128xf32> to vector<1x128xf32>
    %c0_40 = arith.constant 0 : index
    %c0_41 = arith.constant 0 : index
    %c0_42 = arith.constant 0 : index
    %67 = vector.load %arg4[%c0_40, %c0_41, %c0_42] : memref<1x1x128xf32, #tpu.memory_space<vmem>>, vector<1x1x128xf32>
    %68 = vector.shape_cast %67 : vector<1x1x128xf32> to vector<1x128xf32>
    %69 = vector.shape_cast %66 : vector<1x128xf32> to vector<1x1x128xf32>
    tpu.vector_store %arg4[%c0_40, %c0_41, %c0_42], %69 {strides = array<i32>} : memref<1x1x128xf32, #tpu.memory_space<vmem>>, vector<1x1x128xf32>,
    return
  }
  func.func @transform_0(%arg0: i32, %arg1: i32) -> (i32, i32, i32, i32) {
    %c0_i32 = arith.constant 0 : i32
    %c0_i32_0 = arith.constant 0 : i32
    %c0_i32_1 = arith.constant 0 : i32
    return %arg0, %c0_i32, %arg1, %c0_i32_0 : i32, i32, i32, i32
  }
  func.func @transform_1(%arg0: i32, %arg1: i32) -> (i32, i32, i32, i32) {
    %c0_i32 = arith.constant 0 : i32
    %c0_i32_0 = arith.constant 0 : i32
    %c0_i32_1 = arith.constant 0 : i32
    return %arg0, %c0_i32, %arg1, %c0_i32_0 : i32, i32, i32, i32
  }
  func.func @transform_2(%arg0: i32, %arg1: i32) -> (i32, i32, i32) {
    %c0_i32 = arith.constant 0 : i32
    %c0_i32_0 = arith.constant 0 : i32
    return %arg0, %c0_i32, %arg1 : i32, i32, i32
  }
}

</mosaic_0001>

<bundles_post_ra>
// kernel: tpu_custom_call.1
= control target key start
LH: loop header
LB: loop body
LE: loop exit
PB: predicated region body
PF: predicated region fallthrough
CT: control target
= control target key end

     0   :  { %7 = vsyncpa [#allocation3], 0  ;;  %s804_s0 = inlined_call_operand.hbm [shape: f32[2,4,2,128], index: 0, kind: input, shape index: {}]   ;;  %s805_s1 = inlined_call_operand.hbm [shape: s32[2,1,2,128], index: 1, kind: input, shape index: {}]   ;;  %s806_s2 = inlined_call_operand.hbm [shape: f32[2,1,128], index: 2, kind: output, shape index: {}]  }
   0x1   :  { %9 = vsyncpa [#allocation3 + $0x1], 0 }
   0x2   :  { %10 = vsyncpa [#allocation6], 0 }
   0x3   :  { %12 = vsyncpa [#allocation6 + $0x1], 0 }
   0x4   :  { %13 = vsyncpa [#allocation4], 0 }
   0x5   :  { %15 = vsyncpa [#allocation4 + $0x1], 0  ;;  %s661_s9 = smov 0   ;;  %s663_s10 = smov 0  }
   0x6   :  { %s665_s11 = smov 0   ;;  %s667_s12 = smov 0  }
   0x7   :  { %s669_s13 = smov 0   ;;  %s671_s14 = smov 0  }
   0x8 LB: > { %s395_s15 = sadd.s32 4294967295, %s641_s14   ;;  %s396_s16 = sadd.s32 4294967294, %s641_s14   ;;  %s641_s14 = sphi %s671_s14, %s21_s14   ;;  %s637_s13 = sphi %s669_s13, %s816_s13   ;;  %s633_s12 = sphi %s667_s12, %s815_s12   ;;  %s629_s11 = sphi %s665_s11, %s814_s11   ;;  %s625_s10 = sphi %s663_s10, %s813_s10   ;;  %s621_s9 = sphi %s661_s9, %s812_s9  }
   0x9   : > { %s33_s17 = sadd.s32 1, %s637_s13  ;;  %s42_s18 = sadd.s32 1, %s629_s11 }
   0xa   : > { %p35_p0 = scmp.ge.s32.totalorder %s33_s17, 2  ;;  %p49_p1 = scmp.ne.s32.totalorder %s629_s11, %s625_s10 }
   0xb   : > { %p50_p2 = scmp.eq.s32.totalorder %s641_s14, 0  ;;  %p55_p3 = scmp.ne.s32.totalorder %s625_s10, %s621_s9 }
   0xc   : > { %s818_s17 = smov (%p35_p0, %s33_s17), 0  ;;  %p56_p5 = scmp.eq.s32.totalorder %s395_s15, 0 }
   0xd   : > { %p702_p4 = por %p50_p2, %p49_p1  ;;  %s37_s20 = ssub.s32 %s637_s13, %s818_s17 }
   0xe   : > { %p109_p6 = scmp.eq.s32.totalorder %s395_s15, 1  ;;  %p40_p7 = scmp.eq.s32.totalorder %s37_s20, 0 }
   0xf   : > { %p708_p8 = por %p56_p5, %p55_p3  ;;  %p115_p10 = scmp.eq.s32.totalorder %s396_s16, 1 }
  0x10   : > { %p712_p9 = por %p109_p6, %p49_p1  ;;  %p398_p12 = scmp.ge.s32.totalorder %s641_s14, 2 }
  0x11   : > { %s717_s23 = scalar_select %p40_p7, %s629_s11, %s42_s18  }
  0x12   : > { %p719_p11 = por %p115_p10, %p55_p3  ;;  %p430_p13 = scmp.lt.s32.totalorder %s641_s14, 2 }
  0x13   : > { %s135_s25 = sand.u32 1, %s629_s11   ;;  %s412_s27 = sshll.u32 %s637_s13, 3 }
  0x14   : > { %s399_s26 = sshll.u32 %s135_s25, 3  ;;  %s145_s30 = scalar_lea.hbm %s804_s0, %s412_s27 }
  0x15   : > { %s139_s3 = scalar_lea.vmem [#allocation2], %s399_s26  ;;  %s146_s5 = sshll.u32 %s145_s30, 4  ;;  %s147_s5 = int_to_ptr.hbm [resolvable:$true] %s146_s5 }
  0x16   : > { %s148_s4 = sshll.u32 %s139_s3, 4  ;;  %p732_p0 = pnand %p430_p13, %p702_p4  ;;  %s149_s4 = int_to_ptr.vmem [resolvable:$true] %s148_s4 }
  0x17   : > { %p404_p1 = scmp.ge.s32.totalorder %s641_s14, 1  ;;  %s136_s7 = scalar_lea.sflag [#allocation3], %s135_s25 }
  0x18   : > { %s643_s8 = smov 32   ;;  %s644_s15 = smov 2  }
  0x19   : > { %422 = dma.hbm_to_vmem [thread:$0]  (!%p732_p0), %s147_s5, 128, %s149_s4, %s136_s7, %s643_s8, %s643_s8, %s644_s15  }
  0x1a   : > { %p176_p2 = scmp.lt.s32.totalorder %s641_s14, 3  ;;  %s402_s16 = sshll.u32 %s135_s25, 1 }
  0x1b   : > { %s403_s18 = sshll.u32 %s637_s13, 1  ;;  %s162_s27 = scalar_lea.vmem [#allocation5], %s402_s16 }
  0x1c   : > { %p177_p3 = pnand %p404_p1, %p176_p2  ;;  %s167_s19 = scalar_lea.hbm %s805_s1, %s403_s18 }
  0x1d   : > { %s171_s28 = sshll.u32 %s162_s27, 4  ;;  %s169_s29 = sshll.u32 %s167_s19, 4  ;;  %s172_s28 = int_to_ptr.vmem [resolvable:$true] %s171_s28  ;;  %s170_s29 = int_to_ptr.hbm [resolvable:$true] %s169_s29 }
  0x1e   : > { %s159_s30 = scalar_lea.sflag [#allocation6], %s135_s25  ;;  %180 = sbr.rel (%p177_p3) target bundleno = 108 (0x6c), region = 28 }
  0x1f   : > { %425 = dma.hbm_to_vmem [thread:$0]  (!%p732_p0), %s170_s29, 32, %s172_s28, %s159_s30  }
  0x20   : > { %s747_s3 = sand.u32 (!%p177_p3), 1, %s625_s10  }
  0x21   : > { %s405_s4 = sshll.u32 (!%p177_p3), %s747_s3, 3  ;;  %s183_s5 = scalar_lea.sflag (!%p177_p3), [#allocation3], %s747_s3 }
  0x22   : > { %s186_s7 = scalar_lea.vmem (!%p177_p3), [#allocation2], %s405_s4 }
  0x23   : > { %608 = dma.done.wait (%p708_p8), %s183_s5, 128  }
  0x24   : > { %610 = vsyncadd (%p708_p8), %s183_s5, 4294967168  ;;  %s406_s25 = sshll.u32 %s747_s3, 1  ;;  %s193_s6 = scalar_lea.sflag [#allocation6], %s747_s3 }
  0x25   : > { %s196_s8 = scalar_lea.vmem [#allocation5], %s406_s25 }
  0x26   : > { %612 = dma.done.wait (%p708_p8), %s193_s6, 32  }
  0x27   : > { %614 = vsyncadd (%p708_p8), %s193_s6, 4294967264  ;;  %v223_v0 = vld [vmem:[%s186_s7] sm:$0x3]  ;;  %v407_v1 = vld [vmem:[%s186_s7 + $0x2] sm:$0x3]  ;;  %v645_v31 = vmov 0.0   ;;  %s290_s16 = scalar_lea.hbm %s806_s2, %s633_s12 }
  0x28   : > { %v226_v2 = vmax.f32 %v223_v0, %v407_v1  ;;  %v408_v3 = vld [vmem:[%s186_s7 + $0x4] sm:$0x3]  ;;  %v409_v4 = vld [vmem:[%s186_s7 + $0x6] sm:$0x3]  ;;  %v222_v15 = vld [vmem:[%s196_s8] sm:$0x3] }
  0x29   : > { %vm236_vm0 = vcmp.eq.s32.totalorder %v222_v15, 0  ;;  %vm243_vm1 = vcmp.eq.s32.totalorder %v222_v15, 1  ;;  %vm250_vm2 = vcmp.eq.s32.totalorder %v222_v15, 2  ;;  %vm257_vm3 = vcmp.eq.s32.totalorder %v222_v15, 3  ;;  %s221_s18 = scalar_lea.vmem [#allocation7], %s747_s3  ;;  %s294_s26 = sshll.u32 %s290_s16, 4  ;;  %s295_s26 = int_to_ptr.hbm [resolvable:$true] %s294_s26 }
  0x2a   : > { %v229_v5 = vmax.f32 %v226_v2, %v408_v3  ;;  %v237_v18 = vsel %vm236_vm0, %v223_v0, 0.0  ;;  %v238_v32 = vsel %vm236_vm0, 0.25, %v645_v31  ;;  %vm271_vm4 = vcmask 1041408   ;;  %s292_s20 = sshll.u32 %s221_s18, 4  ;;  %s281_s19 = scalar_lea.sflag [#allocation4], %s747_s3  ;;  %s293_s20 = int_to_ptr.vmem [resolvable:$true] %s292_s20 }
  0x2b   : > { %v244_v22 = vsel %vm243_vm1, %v407_v1, %v237_v18  ;;  %v245_v34 = vsel %vm243_vm1, 0.25, %v238_v32  ;;  %s569_s27 = sshra.s32 %s295_s26, 4  ;;  %s575_s12 = scalar_lea.hbm %s806_s2, 2  ;;  %s570_s27 = int_to_ptr.hbm [resolvable:$true] %s569_s27 }
  0x2c   : > { %v232_v6 = vmax.f32 %v229_v5, %v409_v4  ;;  %v251_v25 = vsel %vm250_vm2, %v408_v3, %v244_v22  ;;  %v252_v35 = vsel %vm250_vm2, 0.25, %v245_v34  ;;  %s571_s28 = scalar_lea.hbm %s570_s27, 1  ;;  %p576_p7 = scmp.lt.s32.totalorder %s570_s27, %s806_s2 }
  0x2d   : > { %v258_v26 = vsel %vm257_vm3, %v409_v4, %v251_v25  ;;  %v259_v37 = vsel %vm257_vm3, 0.25, %v252_v35  ;;  %p572_p4 = scmp.ne.s32.totalorder %s570_s27, %s571_s28  ;;  %p577_p8 = scmp.lt.s32.totalorder %s575_s12, %s571_s28 }
  0x2e   : > { %v233_v7 = vsub.f32 %v223_v0, %v232_v6  ;;  %v239_v8 = vsub.f32 %v407_v1, %v232_v6  ;;  %v246_v9 = vsub.f32 %v408_v3, %v232_v6  ;;  %v253_v10 = vsub.f32 %v409_v4, %v232_v6 }
  0x2f   : > { %v260_v27 = vsub.f32 %v258_v26, %v232_v6  ;;  %p573_p5 = pnand %p572_p4, %p712_p9  ;;  %p578_p10 = por %p577_p8, %p576_p7 }
  0x30   : > { %v234_v11 = vmul.f32 1.442695, %v233_v7  ;;  %v240_v12 = vmul.f32 1.442695, %v239_v8  ;;  %v247_v13 = vmul.f32 1.442695, %v246_v9 }
  0x31   : > { %v254_v14 = vmul.f32 1.442695, %v253_v10  ;;  %p574_p6 = pneg %p573_p5 }
  0x32   : > { %483 = vpow2.f32 %v234_v11 }
  0x33   : > { %485 = vpow2.f32 %v240_v12  ;;  %p579_p13 = pnand %p578_p10, %p574_p6 }
  0x34   : > { %487 = vpow2.f32 %v247_v13 }
  0x35   : > { %489 = vpow2.f32 %v254_v14 }
  0x38   : > { %v484_v16 = vpop.eup %483 }
  0x39   : > { %v486_v17 = vpop.eup %485 }
  0x3a   : > { %v488_v19 = vpop.eup %487  ;;  %v242_v20 = vadd.f32 %v486_v17, %v484_v16 }
  0x3b   : > { %v490_v21 = vpop.eup %489 }
  0x3c   : > { %v249_v23 = vadd.f32 %v488_v19, %v242_v20 }
  0x3e   : > { %v256_v24 = vadd.f32 %v490_v21, %v249_v23 }
  0x40   : > { %491 = vlog2.f32 %v256_v24 }
  0x46   : > { %v492_v28 = vpop.eup %491 }
  0x47   : > { %v262_v29 = vmul.f32 0.6931472, %v492_v28 }
  0x49   : > { %v263_v30 = vsub.f32 %v260_v27, %v262_v29 }
  0x4b   : > { %v264_v33 = vmul.f32 1.442695, %v263_v30  ;;  %v266_v39 = vmul.f32 %v263_v30, %v259_v37 }
  0x4d   : > { %493 = vpow2.f32 %v264_v33 }
  0x53   : > { %v494_v36 = vpop.eup %493 }
  0x54   : > { %v267_v38 = vsub.f32 1.0, %v494_v36 }
  0x56   : > { %v268_v40 = vmul.f32 %v267_v38, %v267_v38 }
  0x58   : > { %v269_v41 = vsub.f32 0.0, %v268_v40 }
  0x5a   : > { %v270_v42 = vmul.f32 %v269_v41, %v266_v39 }
  0x5c   : > { %v272_v43 = vsel %vm271_vm4, %v270_v42, 0.0 }
  0x5d   : > { %v273_v44 = vrot.slane %v272_v43, 4 }
  0x5f   : > { %v274_v45 = vadd.f32 %v273_v44, %v272_v43 }
  0x61   : > { %v275_v46 = vrot.slane %v274_v45, 2 }
  0x63   : > { %v276_v47 = vadd.f32 %v275_v46, %v274_v45 }
  0x65   : > { %v277_v48 = vrot.slane %v276_v47, 1 }
  0x67   : > { %v278_v49 = vadd.f32 %v277_v48, %v276_v47 }
  0x69   : > { %279 = vst [vmem:[%s221_s18] sm:$0x1] %v278_v49 }
  0x6a   : > { %582 = shalt.err (!%p579_p13)
}
  0x6b   : > { %417 = dma.vmem_to_hbm [thread:$0]  (%p712_p9), %s293_s20, 16, %s295_s26, %s281_s19  }
  0x6c PF: > { %s306_s3 = sand.u32 1, %s621_s9   ;;  %p427_p0 = pnand %p398_p12, %p719_p11 }
  0x6d   : > { %s307_s7 = scalar_lea.sflag [#allocation4], %s306_s3 }
  0x6e   : > { %p428_p1 = pneg %p427_p0 }
  0x70   : > { %616 = dma.done.wait (%p428_p1), %s307_s7, 16  }
  0x71   : > { %618 = vsyncadd (%p428_p1), %s307_s7, 4294967280  ;;  %s21_s14 = sadd.s32 1, %s641_s14   ;;  %s812_s9 = smov %s625_s10 }
  0x72   : > { %p18_p2 = scmp.ge.s32.totalorder %s21_s14, 4   ;;  %s813_s10 = smov %s629_s11 }
  0x73   : > { %s814_s11 = smov %s717_s23  ;;  %s815_s12 = smov %s637_s13 }
  0x74   : > { %s816_s13 = smov %s818_s17  ;;  %20 = sbr.rel (!%p18_p2) target bundleno = 8 (0x8), region = 89 }
  0x79   :  { %312 = vsyncpa [#allocation3], 1 }
  0x7a   :  { %314 = vsyncpa [#allocation3 + $0x1], 1 }
  0x7b   :  { %315 = vsyncpa [#allocation6], 1 }
  0x7c   :  { %317 = vsyncpa [#allocation6 + $0x1], 1 }
  0x7d   :  { %318 = vsyncpa [#allocation4], 1 }
  0x7e   :  { %320 = vsyncpa [#allocation4 + $0x1], 1 }

</bundles_post_ra>
